<compile_context>
chip_gen: v6e
topology: v6e:2x2x1
jax: 0.10.0
libtpu: 0.0.40
codegen_flags: <defaults>
</compile_context>

<pallas_src>
import jax
import jax.numpy as jnp
from jax import lax
from jax.experimental import pallas as pl
from jax.experimental.pallas import tpu as pltpu


# Row indices of the packed (8, N) constant-parameter block.
_P_EL, _P_G_TAU, _P_R_TAU, _P_INV_TAUS, _P_1MBS, _P_DTH, _P_FV, _P_DV = range(8)


def _lif_r_kernel(state_in_ref, w_ref, p_ref, iext_ref, soft_ref, state_ref):
    """Runs one chunk of LIF_R timesteps with state resident in VMEM.

    state_in_ref: (3, N)   initial [v, s, theta_s]   (used only on grid step 0)
    w_ref:        (N, N)   effective recurrent weights  mask * (w * neuron_types)
    p_ref:        (8, N)   packed per-neuron constants (see _P_* rows)
    iext_ref:     (Tc, N)  external input for this chunk
    soft_ref:     (Tc, N)  soft-spike output for this chunk
    state_ref:    (3, N)   carried state (output accumulator across the grid)
    """
    # Initialize the carried state from the provided initial state once.
    @pl.when(pl.program_id(0) == 0)
    def _():
        state_ref[...] = state_in_ref[...]

    W = w_ref[...]                                   # (N, N)
    EL      = p_ref[_P_EL:_P_EL + 1, :]              # E_L
    g_tau   = p_ref[_P_G_TAU:_P_G_TAU + 1, :]        # G / tau_m
    r_tau   = p_ref[_P_R_TAU:_P_R_TAU + 1, :]        # norm_R_const / tau_m
    inv_ts  = p_ref[_P_INV_TAUS:_P_INV_TAUS + 1, :]  # 1 / tau_s
    one_m_b = p_ref[_P_1MBS:_P_1MBS + 1, :]          # 1 - b_s
    dth     = p_ref[_P_DTH:_P_DTH + 1, :]            # delta_theta_s
    f_v     = p_ref[_P_FV:_P_FV + 1, :]              # f_v
    d_V     = p_ref[_P_DV:_P_DV + 1, :]              # delta_V

    t_chunk = iext_ref.shape[0]

    def step(t, carry):
        v, s, th = carry                                                # (1, N) each
        i_ext = iext_ref[pl.ds(t, 1), :]                                # (1, N)
        i_syn = jnp.dot(s, W, preferred_element_type=jnp.float32)       # (1, N)
        dv = g_tau * (EL - v) + (i_syn + i_ext) * r_tau
        v_next = v + dv
        gating = jnp.clip(v_next / th, 0.0, 1.0)
        ds = (-s + gating * jnp.clip(dv / (th - EL), 0.0, 1.0)) * inv_ts
        s_new = s + ds
        spiked = (v_next >= th).astype(jnp.float32)
        th_new = one_m_b * th + spiked * dth
        v_reset = EL + f_v * (v - EL) - d_V
        v_new = spiked * v_reset + (1.0 - spiked) * v_next
        # NOTE: uses the *updated* theta_s, exactly as in the PyTorch forward.
        soft_ref[pl.ds(t, 1), :] = jax.nn.sigmoid(v_next - th_new)
        return v_new, s_new, th_new

    carry0 = (state_ref[0:1, :], state_ref[1:2, :], state_ref[2:3, :])
    v, s, th = lax.fori_loop(0, t_chunk, step, carry0, unroll=True)

    state_ref[0:1, :] = v
    state_ref[1:2, :] = s
    state_ref[2:3, :] = th


def _pack_constants(params):
    """Host-side precomputation of everything constant across timesteps."""
    f32 = lambda x: jnp.asarray(x, jnp.float32)
    w_eff = f32(params['mask']) * (f32(params['w']) * f32(params['neuron_types']))
    tau_m = f32(params['tau_m'])
    packed = jnp.stack([
        f32(params['E_L']),
        f32(params['G']) / tau_m,
        f32(params['norm_R_const']) / tau_m,
        1.0 / f32(params['tau_s']),
        1.0 - f32(params['b_s']),
        f32(params['delta_theta_s']),
        f32(params['f_v']),
        f32(params['delta_V']),
    ], axis=0)                                                  # (8, N)
    return w_eff, packed


def _pick_chunk(T):
    for c in (16, 8):
        if T % c == 0:
            return c
    return T  # single grid step; block dim equals the full array dim


@jax.jit
def lif_r_simulate(I_ext_seq, state, params):
    """Simulate T LIF_R steps in one fused Pallas call.

    I_ext_seq: (T, N) float32 external inputs, one row per timestep.
    state: dict with 'v', 's', 'theta_s' of shape (N,)
    params: dict with 'w','neuron_types','mask' (N,N) and per-neuron vectors
            'G','E_L','tau_m','tau_s','b_s','delta_theta_s','f_v','delta_V',
            'norm_R_const' of shape (N,)
    Returns: soft_spiked (T, N), final state dict.
    """
    I_ext_seq = jnp.asarray(I_ext_seq, jnp.float32)
    T, N = I_ext_seq.shape
    chunk = _pick_chunk(T)
    w_eff, p = _pack_constants(params)
    state0 = jnp.stack([jnp.asarray(state['v'], jnp.float32),
                        jnp.asarray(state['s'], jnp.float32),
                        jnp.asarray(state['theta_s'], jnp.float32)], axis=0)  # (3, N)

    soft, state_out = pl.pallas_call(
        _lif_r_kernel,
        out_shape=(jax.ShapeDtypeStruct((T, N), jnp.float32),
                   jax.ShapeDtypeStruct((3, N), jnp.float32)),
        grid=(T // chunk,),
        in_specs=[
            pl.BlockSpec((3, N), lambda c: (0, 0)),       # initial state
            pl.BlockSpec((N, N), lambda c: (0, 0)),       # W_eff
            pl.BlockSpec((8, N), lambda c: (0, 0)),       # packed constants
            pl.BlockSpec((chunk, N), lambda c: (c, 0)),   # I_ext chunk
        ],
        out_specs=(
            pl.BlockSpec((chunk, N), lambda c: (c, 0)),   # soft-spike chunk
            pl.BlockSpec((3, N), lambda c: (0, 0)),       # carried / final state
        ),
        compiler_params=pltpu.CompilerParams(
            dimension_semantics=("arbitrary",)),          # sequential state carry
    )(state0, w_eff, p, I_ext_seq)

    new_state = {'v': state_out[0], 's': state_out[1], 'theta_s': state_out[2]}
    return soft, new_state


def lif_r_forward(I_ext, state, params):
    """One LIF_R step (the original module's forward). T=1 case of the fused kernel."""
    soft, new_state = lif_r_simulate(jnp.asarray(I_ext, jnp.float32).reshape(1, -1),
                                     state, params)
    return soft[0], new_state


# ----------------------------------------------------------------------------
# Pure-JAX reference mirroring the PyTorch forward exactly (for verification).
# ----------------------------------------------------------------------------
def _reference_step(I_ext, state, params):
    v, s, th = state['v'], state['s'], state['theta_s']
    W_syn = params['w'] * params['neuron_types']
    I_syn = jnp.dot(s, params['mask'] * W_syn, precision=jax.lax.Precision.HIGHEST)
    dv = (params['G'] * (params['E_L'] - v)
          + (I_syn + I_ext) * params['norm_R_const']) / params['tau_m']
    v_next = v + dv
    gating = jnp.clip(v_next / th, 0.0, 1.0)
    dv_max = th - params['E_L']
    ds = (-s + gating * jnp.clip(dv / dv_max, 0.0, 1.0)) / params['tau_s']
    s_new = s + ds
    spiked = (v_next >= th).astype(jnp.float32)
    not_spiked = (spiked - 1.0) / -1.0
    th_new = (1.0 - params['b_s']) * th + spiked * params['delta_theta_s']
    v_reset = params['E_L'] + params['f_v'] * (v - params['E_L']) - params['delta_V']
    v_new = spiked * v_reset + not_spiked * v_next
    soft = jax.nn.sigmoid(v_next - th_new)
    return soft, {'v': v_new, 's': s_new, 'theta_s': th_new}


def _reference_simulate(I_ext_seq, state, params):
    softs = []
    for t in range(I_ext_seq.shape[0]):
        soft, state = _reference_step(I_ext_seq[t], state, params)
        softs.append(soft)
    return jnp.stack(softs, axis=0), state


def make_params_and_state(N=12, w_mean=0.3, w_var=0.2, seed=0):
    """Deterministic synthetic initialization mirroring LIF_R_lower_dim.__init__."""
    key = jax.random.PRNGKey(seed)
    k_w, _ = jax.random.split(key)

    scalar_params = {
        'tau_m': 4.5, 'tau_s': 4.5, 'E_L': -60.0, 'G': 0.7,
        'delta_theta_s': 25.0, 'b_s': 0.3, 'f_v': 0.14, 'delta_V': 6.0,
    }
    ones = jnp.ones((N,), jnp.float32)
    tau_m = jnp.clip(ones * scalar_params['tau_m'], 1.5, 8.0)
    tau_s = jnp.clip(ones * scalar_params['tau_s'], 1.0, 12.0)
    E_L = jnp.clip(ones * scalar_params['E_L'], -80.0, -35.0)
    G = jnp.clip(ones * scalar_params['G'], 0.1, 0.99)
    b_s = jnp.clip(ones * scalar_params['b_s'], 0.01, 0.99)
    f_v = jnp.clip(ones * scalar_params['f_v'], 0.01, 0.99)
    delta_V = jnp.clip(ones * scalar_params['delta_V'], 1.0, 35.0)
    delta_theta_s = ones * scalar_params['delta_theta_s']
    norm_R_const = (delta_theta_s - E_L) * 1.1

    # rand_ws = w_mean - w_var + 2*w_var*rand((N,N))
    w = w_mean - w_var + 2.0 * w_var * jax.random.uniform(k_w, (N, N), jnp.float32)

    # neuron types: +1 / -1 per presynaptic neuron (row i = type of neuron i)
    nt_vec = jnp.where(jnp.arange(N) % 2 == 0, 1.0, -1.0).astype(jnp.float32)
    neuron_types = jnp.broadcast_to(nt_vec[:, None], (N, N))

    mask = jnp.ones((N, N), jnp.float32) - jnp.eye(N, dtype=jnp.float32)

    params = {
        'w': w, 'neuron_types': neuron_types, 'mask': mask,
        'G': G, 'E_L': E_L, 'tau_m': tau_m, 'tau_s': tau_s, 'b_s': b_s,
        'delta_theta_s': delta_theta_s, 'f_v': f_v, 'delta_V': delta_V,
        'norm_R_const': norm_R_const,
    }
    # state after reset(): v = E_L, s = 0, theta_s = delta_theta_s
    state = {'v': E_L, 's': jnp.zeros((N,), jnp.float32), 'theta_s': delta_theta_s}
    return params, state


if __name__ == "__main__":
    N, T = 12, 64
    params, state = make_params_and_state(N=N, seed=0)

    key_in = jax.random.PRNGKey(0)
    I_seq = jax.random.uniform(key_in, (T, N), jnp.float32)

    # --- Single-step check: exactly the module's forward semantics ---
    soft1, st1 = lif_r_forward(I_seq[0], state, params)
    soft1 = jax.block_until_ready(soft1)
    soft1_ref, st1_ref = _reference_step(I_seq[0], state, params)
    assert jnp.allclose(soft1, soft1_ref, atol=1e-5, rtol=1e-5)
    for k in ('v', 's', 'theta_s'):
        assert jnp.allclose(st1[k], st1_ref[k], atol=1e-5, rtol=1e-5), k

    # --- Fused multi-step simulation check (T steps in one pallas_call) ---
    soft_seq, st_T = lif_r_simulate(I_seq, state, params)
    soft_seq = jax.block_until_ready(soft_seq)
    jax.block_until_ready(st_T['v'])
    soft_ref, st_ref = _reference_simulate(I_seq, state, params)
    assert jnp.allclose(soft_seq, soft_ref, atol=5e-3, rtol=5e-3)
    for k in ('v', 's', 'theta_s'):
        assert jnp.allclose(st_T[k], st_ref[k], atol=5e-3, rtol=5e-3), k

    print("KERNEL_OK")
</pallas_src>

<mosaic_0001>
module attributes {stable_mosaic.version = 11 : i64} {
  func.func @_lif_r_kernel(%arg0: i32, %arg1: memref<3x12xf32, #tpu.memory_space<vmem>>, %arg2: memref<12x12xf32, #tpu.memory_space<vmem>>, %arg3: memref<8x12xf32, #tpu.memory_space<vmem>>, %arg4: memref<1x12xf32, #tpu.memory_space<vmem>>, %arg5: memref<1x12xf32, #tpu.memory_space<vmem>>, %arg6: memref<3x12xf32, #tpu.memory_space<vmem>>) attributes {dimension_semantics = [#tpu.dimension_semantics<arbitrary>], iteration_bounds = array<i64: 1>, scalar_prefetch = 0 : i64, scratch_operands = 0 : i64, tpu.core_type = #tpu.core_type<tc>, window_params = [{pipeline_mode = #tpu.pipeline_mode<synchronous>, transform_indices = @transform_0, window_bounds = array<i64: 3, 12>}, {pipeline_mode = #tpu.pipeline_mode<synchronous>, transform_indices = @transform_1, window_bounds = array<i64: 12, 12>}, {pipeline_mode = #tpu.pipeline_mode<synchronous>, transform_indices = @transform_2, window_bounds = array<i64: 8, 12>}, {transform_indices = @transform_3, window_bounds = array<i64: 1, 12>}, {transform_indices = @transform_4, window_bounds = array<i64: 1, 12>}, {pipeline_mode = #tpu.pipeline_mode<synchronous>, transform_indices = @transform_5, window_bounds = array<i64: 3, 12>}]} {
    %c0_i32 = arith.constant 0 : i32
    %0 = arith.cmpi eq, %arg0, %c0_i32 : i32
    %1 = arith.extui %0 : i1 to i32
    %c0_i32_0 = arith.constant 0 : i32
    %2 = arith.cmpi ne, %1, %c0_i32_0 : i32
    scf.if %2 {
      %c0_33 = arith.constant 0 : index
      %c0_34 = arith.constant 0 : index
      %67 = vector.load %arg1[%c0_33, %c0_34] : memref<3x12xf32, #tpu.memory_space<vmem>>, vector<3x12xf32>
      %c0_35 = arith.constant 0 : index
      %c0_36 = arith.constant 0 : index
      %68 = vector.load %arg6[%c0_35, %c0_36] : memref<3x12xf32, #tpu.memory_space<vmem>>, vector<3x12xf32>
      tpu.vector_store %arg6[%c0_35, %c0_36], %67 {strides = array<i32>} : memref<3x12xf32, #tpu.memory_space<vmem>>, vector<3x12xf32>,
    } else {
    }
    %c0 = arith.constant 0 : index
    %c0_1 = arith.constant 0 : index
    %3 = vector.load %arg2[%c0, %c0_1] : memref<12x12xf32, #tpu.memory_space<vmem>>, vector<12x12xf32>
    %c0_2 = arith.constant 0 : index
    %c0_3 = arith.constant 0 : index
    %4 = vector.load %arg3[%c0_2, %c0_3] : memref<8x12xf32, #tpu.memory_space<vmem>>, vector<1x12xf32>
    %c1 = arith.constant 1 : index
    %c0_4 = arith.constant 0 : index
    %5 = vector.load %arg3[%c1, %c0_4] : memref<8x12xf32, #tpu.memory_space<vmem>>, vector<1x12xf32>
    %c2 = arith.constant 2 : index
    %c0_5 = arith.constant 0 : index
    %6 = vector.load %arg3[%c2, %c0_5] : memref<8x12xf32, #tpu.memory_space<vmem>>, vector<1x12xf32>
    %c3 = arith.constant 3 : index
    %c0_6 = arith.constant 0 : index
    %7 = vector.load %arg3[%c3, %c0_6] : memref<8x12xf32, #tpu.memory_space<vmem>>, vector<1x12xf32>
    %c4 = arith.constant 4 : index
    %c0_7 = arith.constant 0 : index
    %8 = vector.load %arg3[%c4, %c0_7] : memref<8x12xf32, #tpu.memory_space<vmem>>, vector<1x12xf32>
    %c5 = arith.constant 5 : index
    %c0_8 = arith.constant 0 : index
    %9 = vector.load %arg3[%c5, %c0_8] : memref<8x12xf32, #tpu.memory_space<vmem>>, vector<1x12xf32>
    %c6 = arith.constant 6 : index
    %c0_9 = arith.constant 0 : index
    %10 = vector.load %arg3[%c6, %c0_9] : memref<8x12xf32, #tpu.memory_space<vmem>>, vector<1x12xf32>
    %c7 = arith.constant 7 : index
    %c0_10 = arith.constant 0 : index
    %11 = vector.load %arg3[%c7, %c0_10] : memref<8x12xf32, #tpu.memory_space<vmem>>, vector<1x12xf32>
    %c0_11 = arith.constant 0 : index
    %c0_12 = arith.constant 0 : index
    %12 = vector.load %arg6[%c0_11, %c0_12] : memref<3x12xf32, #tpu.memory_space<vmem>>, vector<1x12xf32>
    %c1_13 = arith.constant 1 : index
    %c0_14 = arith.constant 0 : index
    %13 = vector.load %arg6[%c1_13, %c0_14] : memref<3x12xf32, #tpu.memory_space<vmem>>, vector<1x12xf32>
    %c2_15 = arith.constant 2 : index
    %c0_16 = arith.constant 0 : index
    %14 = vector.load %arg6[%c2_15, %c0_16] : memref<3x12xf32, #tpu.memory_space<vmem>>, vector<1x12xf32>
    %c0_i32_17 = arith.constant 0 : i32
    %15 = arith.index_cast %c0_i32_17 : i32 to index
    %c0_18 = arith.constant 0 : index
    %16 = vector.load %arg4[%15, %c0_18] : memref<1x12xf32, #tpu.memory_space<vmem>>, vector<1x12xf32>
    %cst = arith.constant dense<0.000000e+00> : vector<1x12xf32>
    %17 = tpu.matmul %13, %3, %cst {dimension_numbers = #tpu.dot_dimension_numbers<[1], [0], [0], [1], [0, 0, 1, 1], [], []>} : vector<1x12xf32>, vector<12x12xf32>, vector<1x12xf32> -> vector<1x12xf32>
    %18 = arith.subf %4, %12 : vector<1x12xf32>
    %19 = arith.mulf %5, %18 : vector<1x12xf32>
    %20 = arith.addf %17, %16 : vector<1x12xf32>
    %21 = arith.mulf %20, %6 : vector<1x12xf32>
    %22 = arith.addf %19, %21 : vector<1x12xf32>
    %23 = arith.addf %12, %22 : vector<1x12xf32>
    %24 = arith.divf %23, %14 : vector<1x12xf32>
    %cst_19 = arith.constant 0.000000e+00 : f32
    %cst_20 = arith.constant 1.000000e+00 : f32
    %25 = vector.broadcast %cst_19 : f32 to vector<1x12xf32>
    %26 = arith.maximumf %25, %24 : vector<1x12xf32>
    %27 = vector.broadcast %cst_20 : f32 to vector<1x12xf32>
    %28 = arith.minimumf %27, %26 : vector<1x12xf32>
    %cst_21 = arith.constant 0.000000e+00 : f32
    %29 = vector.broadcast %cst_21 : f32 to vector<1x12xf32>
    %30 = arith.subf %29, %13 : vector<1x12xf32>
    %31 = arith.subf %14, %4 : vector<1x12xf32>
    %32 = arith.divf %22, %31 : vector<1x12xf32>
    %cst_22 = arith.constant 0.000000e+00 : f32
    %cst_23 = arith.constant 1.000000e+00 : f32
    %33 = vector.broadcast %cst_22 : f32 to vector<1x12xf32>
    %34 = arith.maximumf %33, %32 : vector<1x12xf32>
    %35 = vector.broadcast %cst_23 : f32 to vector<1x12xf32>
    %36 = arith.minimumf %35, %34 : vector<1x12xf32>
    %37 = arith.mulf %28, %36 : vector<1x12xf32>
    %38 = arith.addf %30, %37 : vector<1x12xf32>
    %39 = arith.mulf %38, %7 : vector<1x12xf32>
    %40 = arith.addf %13, %39 : vector<1x12xf32>
    %41 = arith.cmpf oge, %23, %14 : vector<1x12xf32>
    %42 = arith.extui %41 : vector<1x12xi1> to vector<1x12xi32>
    %43 = arith.sitofp %42 : vector<1x12xi32> to vector<1x12xf32>
    %44 = arith.mulf %8, %14 : vector<1x12xf32>
    %45 = arith.mulf %43, %9 : vector<1x12xf32>
    %46 = arith.addf %44, %45 : vector<1x12xf32>
    %47 = arith.subf %12, %4 : vector<1x12xf32>
    %48 = arith.mulf %10, %47 : vector<1x12xf32>
    %49 = arith.addf %4, %48 : vector<1x12xf32>
    %50 = arith.subf %49, %11 : vector<1x12xf32>
    %51 = arith.mulf %43, %50 : vector<1x12xf32>
    %cst_24 = arith.constant 1.000000e+00 : f32
    %52 = vector.broadcast %cst_24 : f32 to vector<1x12xf32>
    %53 = arith.subf %52, %43 : vector<1x12xf32>
    %54 = arith.mulf %53, %23 : vector<1x12xf32>
    %55 = arith.addf %51, %54 : vector<1x12xf32>
    %56 = arith.subf %23, %46 : vector<1x12xf32>
    %57 = arith.negf %56 : vector<1x12xf32>
    %58 = math.exp %57 : vector<1x12xf32>
    %cst_25 = arith.constant 1.000000e+00 : f32
    %59 = vector.broadcast %cst_25 : f32 to vector<1x12xf32>
    %60 = arith.addf %59, %58 : vector<1x12xf32>
    %61 = arith.divf %59, %60 : vector<1x12xf32>
    %62 = arith.index_cast %c0_i32_17 : i32 to index
    %c0_26 = arith.constant 0 : index
    %63 = vector.load %arg5[%62, %c0_26] : memref<1x12xf32, #tpu.memory_space<vmem>>, vector<1x12xf32>
    tpu.vector_store %arg5[%62, %c0_26], %61 {strides = array<i32>} : memref<1x12xf32, #tpu.memory_space<vmem>>, vector<1x12xf32>,
    %c1_i32 = arith.constant 1 : i32
    %c0_27 = arith.constant 0 : index
    %c0_28 = arith.constant 0 : index
    %64 = vector.load %arg6[%c0_27, %c0_28] : memref<3x12xf32, #tpu.memory_space<vmem>>, vector<1x12xf32>
    tpu.vector_store %arg6[%c0_27, %c0_28], %55 {strides = array<i32>} : memref<3x12xf32, #tpu.memory_space<vmem>>, vector<1x12xf32>,
    %c1_29 = arith.constant 1 : index
    %c0_30 = arith.constant 0 : index
    %65 = vector.load %arg6[%c1_29, %c0_30] : memref<3x12xf32, #tpu.memory_space<vmem>>, vector<1x12xf32>
    tpu.vector_store %arg6[%c1_29, %c0_30], %40 {strides = array<i32>} : memref<3x12xf32, #tpu.memory_space<vmem>>, vector<1x12xf32>,
    %c2_31 = arith.constant 2 : index
    %c0_32 = arith.constant 0 : index
    %66 = vector.load %arg6[%c2_31, %c0_32] : memref<3x12xf32, #tpu.memory_space<vmem>>, vector<1x12xf32>
    tpu.vector_store %arg6[%c2_31, %c0_32], %46 {strides = array<i32>} : memref<3x12xf32, #tpu.memory_space<vmem>>, vector<1x12xf32>,
    return
  }
  func.func @transform_0(%arg0: i32) -> (i32, i32) {
    %c0_i32 = arith.constant 0 : i32
    %c0_i32_0 = arith.constant 0 : i32
    %c0_i32_1 = arith.constant 0 : i32
    return %c0_i32, %c0_i32_0 : i32, i32
  }
  func.func @transform_1(%arg0: i32) -> (i32, i32) {
    %c0_i32 = arith.constant 0 : i32
    %c0_i32_0 = arith.constant 0 : i32
    %c0_i32_1 = arith.constant 0 : i32
    return %c0_i32, %c0_i32_0 : i32, i32
  }
  func.func @transform_2(%arg0: i32) -> (i32, i32) {
    %c0_i32 = arith.constant 0 : i32
    %c0_i32_0 = arith.constant 0 : i32
    %c0_i32_1 = arith.constant 0 : i32
    return %c0_i32, %c0_i32_0 : i32, i32
  }
  func.func @transform_3(%arg0: i32) -> (i32, i32) {
    %c0_i32 = arith.constant 0 : i32
    %c0_i32_0 = arith.constant 0 : i32
    return %arg0, %c0_i32 : i32, i32
  }
  func.func @transform_4(%arg0: i32) -> (i32, i32) {
    %c0_i32 = arith.constant 0 : i32
    %c0_i32_0 = arith.constant 0 : i32
    return %arg0, %c0_i32 : i32, i32
  }
  func.func @transform_5(%arg0: i32) -> (i32, i32) {
    %c0_i32 = arith.constant 0 : i32
    %c0_i32_0 = arith.constant 0 : i32
    %c0_i32_1 = arith.constant 0 : i32
    return %c0_i32, %c0_i32_0 : i32, i32
  }
}

</mosaic_0001>

<bundles_post_ra>
// kernel: lif_r_simulate.1
= control target key start
LH: loop header
LB: loop body
LE: loop exit
PB: predicated region body
PF: predicated region fallthrough
CT: control target
= control target key end

     0   :  { %vm47_vm0 = vcmask 1043456   ;;  %v229_v1 = vmov 0.0   ;;  %vm230_vm1 = vmmov 0   ;;  %vm25_vm2 = vcmask 92160   ;;  %s326_s0 = inlined_call_operand.vmem [shape: f32[3,12], index: 0, kind: input, shape index: {}]   ;;  %s327_s1 = inlined_call_operand.vmem [shape: f32[12,12], index: 1, kind: input, shape index: {}]   ;;  %s328_s2 = inlined_call_operand.vmem [shape: f32[8,12], index: 2, kind: input, shape index: {}]   ;;  %s329_s3 = inlined_call_operand.vmem [shape: f32[1,12], index: 3, kind: input, shape index: {}]   ;;  %s330_s4 = inlined_call_operand.hbm [shape: f32[1,12], index: 4, kind: output, shape index: {0}]   ;;  %s331_s5 = inlined_call_operand.vmem [shape: f32[3,12], index: 5, kind: output, shape index: {1}]  }
   0x1   :  { %v28_v0 = vld [vmem:[%s327_s1 + $0x8] sm:$0xf]  ;;  %189 = vmatprep.subr.mxu0 %v229_v1  ;;  %v27_v2 = vld [vmem:[%s327_s1] sm:$0xff]  ;;  %193 = vmatprep.mubr.msk.f32.mxu0 %vm230_vm1, %v229_v1 }
   0x2   :  { %v24_v3 = vld [vmem:[%s326_s0] sm:$0x7]  ;;  %190 = vmatpush3.msk.msra.mxu0 %vm47_vm0, %v28_v0 }
   0x3   :  { %26 = vst.msk [vmem:[%s331_s5] sm:$0x7] %vm25_vm2, %v24_v3  ;;  %191 = vmatprep.subr.mxu0 %v229_v1 }
   0x4   :  { %192 = vmatpush3.msra.mxu0 %v27_v2 }
   0x5   :  { %11 = vsyncpa [#allocation3], 0  ;;  %vm43_vm3 = vcmask 97280   ;;  %v29_v5 = vld [vmem:[%s328_s2] sm:$0x1]  ;;  %vm159_vm5 = vcmask 90112  }
   0x6   :  { %v30_v10 = vld [vmem:[%s328_s2 + $0x1] sm:$0x1]  ;;  %v40_v11 = vld [vmem:[%s329_s3] sm:$0x1]  ;;  %v35_v13 = vld [vmem:[%s328_s2 + $0x6] sm:$0x1] }
   0x7   :  { %v31_v14 = vld [vmem:[%s328_s2 + $0x2] sm:$0x1]  ;;  %v33_v24 = vld [vmem:[%s328_s2 + $0x4] sm:$0x1]  ;;  %v36_v26 = vld [vmem:[%s328_s2 + $0x7] sm:$0x1] }
   0x8   :  { %v34_v29 = vld [vmem:[%s328_s2 + $0x5] sm:$0x1]  ;;  %v32_v46 = vld [vmem:[%s328_s2 + $0x3] sm:$0x1]  ;;  %s231_s2 = smov [#allocation2]  }
   0x9   :  { %s170_s1 = sshll.u32 %s231_s2, 4  ;;  %s171_s1 = int_to_ptr.vmem [resolvable:$true] %s170_s1 }
   0xa   :  { %v38_v4 = vld [vmem:[%s331_s5 + $0x1] sm:$0x1]  ;;  %v39_v6 = vld [vmem:[%s331_s5 + $0x2] sm:$0x1]  ;;  %v37_v8 = vld [vmem:[%s331_s5] sm:$0x1]  ;;  %p212_p1 = scmp.lt.s32.totalorder %s171_s1, %s171_s1 }
   0xb   :  { %194 = vmatmul.mubr.msk.f32.vlgmr.msra.gmra.mxu0 %vm43_vm3, %v38_v4  ;;  %v129_v7 = vsub.f32 %v39_v6, %v29_v5  ;;  %v41_v9 = vsub.f32 %v29_v5, %v37_v8  ;;  %v144_v12 = vsub.f32 %v37_v8, %v29_v5  ;;  %v141_v32 = vmul.f32 %v39_v6, %v33_v24  ;;  %s207_s28 = scalar_lea.vmem %s171_s1, 16  ;;  %s211_s0 = scalar_lea.vmem %s171_s1, 32 }
   0xc   :  { %v128_v38 = vsub.f32 0.0, %v38_v4  ;;  %p208_p0 = scmp.ne.s32.totalorder %s171_s1, %s207_s28  ;;  %p213_p2 = scmp.lt.s32.totalorder %s211_s0, %s207_s28 }
   0xd   :  { %199 = vrcp.f32 %v129_v7  ;;  %v42_v16 = vmul.f32 %v41_v9, %v30_v10  ;;  %v145_v18 = vmul.f32 %v144_v12, %v35_v13 }
   0xe   :  { %201 = vrcp.f32 %v39_v6  ;;  %p214_p3 = por %p213_p2, %p212_p1 }
   0xf   :  { %v146_v25 = vadd.f32 %v145_v18, %v29_v5 }
  0x10   :  { %p215_p4 = pnand %p214_p3, %p208_p0 }
  0x11   :  { %v147_v34 = vsub.f32 %v146_v25, %v36_v26 }
  0x1a   :  { %v200_v21 = vpop.eup %199 }
  0x1b   :  { %v202_v23 = vpop.eup %201 }
  0xcb   :  { %v117_v15 = vpop.f32.mrf.mxu0 }
  0xcc   :  { %v118_v17 = vadd.f32 %v117_v15, %v40_v11 }
  0xcd   :  { %v195_v19 = vpop.f32.mrf.mxu0 }
  0xce   :  { %v121_v20 = vmul.f32 %v118_v17, %v31_v14 }
  0xd0   :  { %v122_v22 = vadd.f32 %v121_v20, %v42_v16 }
  0xd2   :  { %v123_v27 = vadd.f32 %v122_v22, %v37_v8  ;;  %v131_v28 = vmul.f32 %v200_v21, %v122_v22 }
  0xd4   :  { %v125_v30 = vmul.f32 %v202_v23, %v123_v27  ;;  %v132_v31 = vmax.f32 %v131_v28, 0.0  ;;  %vm138_vm4 = vcmp.ge.f32.partialorder %v123_v27, %v39_v6 }
  0xd5   :  { %v184_v33 = vsel %vm138_vm4, 1.0, %v229_v1 }
  0xd6   :  { %v126_v35 = vmax.f32 %v125_v30, 0.0  ;;  %v142_v36 = vmul.f32 %v184_v33, %v34_v29  ;;  %v149_v37 = vsub.f32 1.0, %v184_v33  ;;  %v133_v40 = vmin.f32 %v132_v31, 1.0 }
  0xd7   :  { %v148_v42 = vmul.f32 %v184_v33, %v147_v34 }
  0xd8   :  { %v127_v39 = vmin.f32 %v126_v35, 1.0  ;;  %v143_v41 = vadd.f32 %v142_v36, %v141_v32  ;;  %v150_v43 = vmul.f32 %v149_v37, %v123_v27 }
  0xda   :  { %v134_v44 = vmul.f32 %v133_v40, %v127_v39  ;;  %v152_v45 = vsub.f32 %v123_v27, %v143_v41  ;;  %163 = vst.msk [vmem:[%s331_s5 + $0x2] sm:$0x1] %vm159_vm5, %v143_v41  ;;  %v151_v47 = vadd.f32 %v150_v43, %v148_v42 }
  0xdc   :  { %v135_v48 = vadd.f32 %v134_v44, %v128_v38  ;;  %v185_v49 = vmul.f32 -1.442695, %v152_v45  ;;  %161 = vst.msk [vmem:[%s331_s5] sm:$0x1] %vm159_vm5, %v151_v47 }
  0xde   :  { %v136_v50 = vmul.f32 %v135_v48, %v32_v46  ;;  %203 = vpow2.f32 %v185_v49 }
  0xe0   :  { %v137_v51 = vadd.f32 %v136_v50, %v38_v4 }
  0xe2   :  { %162 = vst.msk [vmem:[%s331_s5 + $0x1] sm:$0x1] %vm159_vm5, %v137_v51 }
  0xeb   :  { %v204_v52 = vpop.eup %203 }
  0xec   :  { %v156_v53 = vadd.f32 1.0, %v204_v52 }
  0xee   :  { %205 = vrcp.f32 %v156_v53 }
  0xfb   :  { %v206_v54 = vpop.eup %205 }
  0xfc   :  { %160 = vst.msk [vmem:[#allocation2] sm:$0x1] %vm159_vm5, %v206_v54 }
  0xfd   :  { %218 = shalt.err (!%p215_p4)
}
  0xfe   :  { %173 = dma.vmem_to_hbm [thread:$0]  %s171_s1, 16, %s330_s4, [#allocation3]  }
  0xff   :  { %227 = dma.done.wait [#allocation3], 16  }
 0x100   :  { %228 = vsyncadd [#allocation3], 4294967280 }
 0x101   :  { %181 = vsyncpa [#allocation3], 1 }

</bundles_post_ra>
